<compile_context>
chip_gen: v7x
topology: tpu7x:2x2x1
jax: 0.10.0
libtpu: 0.0.40
codegen_flags: <defaults>
</compile_context>

<pallas_src>
import jax
import jax.numpy as jnp
import numpy as np
from jax.experimental import pallas as pl
from jax.experimental.pallas import tpu as pltpu


# ---------------------------------------------------------------------------
# Pallas kernel: identity pass-through (the module's forward is abstract).
# ---------------------------------------------------------------------------
def _identity_kernel(x_ref, o_ref):
    o_ref[...] = x_ref[...]


_MAX_TILE_BYTES = 4 * 1024 * 1024  # per pipeline buffer; 4 buffers -> <=16 MiB VMEM


def _sublane_multiple(dtype) -> int:
    """Dtype-dependent sublane packing: 8 for 4-byte, 16 for 2-byte, 32 for 1-byte."""
    itemsize = jnp.dtype(dtype).itemsize
    return {4: 8, 2: 16, 1: 32}.get(itemsize, 8)


def model_forward(x: jax.Array) -> jax.Array:
    """Pass-through "forward" implemented as an aliased, large-tile Pallas copy."""
    rows, cols = x.shape
    itemsize = jnp.dtype(x.dtype).itemsize
    sub = _sublane_multiple(x.dtype)

    # Largest sublane-aligned row tile that keeps each pipeline buffer <= cap.
    max_rows = max(sub, (_MAX_TILE_BYTES // max(1, cols * itemsize)) // sub * sub)
    if rows <= max_rows:
        tile_rows = rows          # full-extent block: always a legal block shape
    else:
        tile_rows = max_rows      # multiple of the dtype sublane pack

    grid = (pl.cdiv(rows, tile_rows),)
    nbytes = rows * cols * itemsize

    return pl.pallas_call(
        _identity_kernel,
        out_shape=jax.ShapeDtypeStruct((rows, cols), x.dtype),
        grid=grid,
        in_specs=[pl.BlockSpec((tile_rows, cols), lambda i: (i, 0))],
        out_specs=pl.BlockSpec((tile_rows, cols), lambda i: (i, 0)),
        # Output aliases input buffer 0: no separate output allocation, and the
        # HBM round trip collapses to an (overlappable) in-place writeback.
        input_output_aliases={0: 0},
        cost_estimate=pl.CostEstimate(
            flops=0, transcendentals=0, bytes_accessed=2 * nbytes
        ),
        compiler_params=pltpu.CompilerParams(
            # Row axis is embarrassingly parallel; v7x's 2 TensorCores shard it.
            dimension_semantics=("parallel",),
            # Headroom above the 16/32 MiB scoped defaults, well under v7x's
            # 64 MiB physical VMEM.
            vmem_limit_bytes=48 * 1024 * 1024,
        ),
    )(x)


# ---------------------------------------------------------------------------
# Host-side glue mirroring Model.xavier_initialization(): deterministic
# xavier-normal init of a (dummy) weight parameter.  save()/load() are pure
# host I/O (torch.save / torch.load) and have no Pallas equivalent.
# TODO(synk): save()/load() are filesystem I/O only — intentionally not ported.
# ---------------------------------------------------------------------------
def xavier_normal_init(key, fan_in: int, fan_out: int) -> jax.Array:
    std = (2.0 / (fan_in + fan_out)) ** 0.5
    return std * jax.random.normal(key, (fan_in, fan_out), dtype=jnp.float32)


if __name__ == "__main__":
    key = jax.random.PRNGKey(0)
    k_x, k_w = jax.random.split(key)

    # Small example input consistent with a generic base model: [batch, hidden]
    x = jax.random.normal(k_x, (64, 128), dtype=jnp.float32)

    # Host copy for the check: the device buffer of `x` may be donated to the
    # aliased output.
    expected = np.asarray(jax.device_get(x))

    # Deterministic parameter init (unused by the abstract forward).
    _dummy_weight = xavier_normal_init(k_w, 128, 128)

    y = model_forward(x)
    y = jax.block_until_ready(y)

    # Sanity check: identity pass-through must match the input exactly.
    y_host = np.asarray(jax.device_get(y))
    assert y_host.shape == expected.shape and y_host.dtype == expected.dtype
    assert bool(np.all(y_host == expected))

    print("KERNEL_OK")
</pallas_src>

<mosaic_0001>
module attributes {stable_mosaic.version = 11 : i64} {
  func.func @_identity_kernel(%arg0: i32, %arg1: memref<64x128xf32, #tpu.memory_space<vmem>>, %arg2: memref<64x128xf32, #tpu.memory_space<vmem>>) attributes {dimension_semantics = [#tpu.dimension_semantics<parallel>], iteration_bounds = array<i64: 1>, scalar_prefetch = 0 : i64, scratch_operands = 0 : i64, tpu.core_type = #tpu.core_type<tc>, window_params = [{transform_indices = @transform_0, window_bounds = array<i64: 64, 128>}, {transform_indices = @transform_1, window_bounds = array<i64: 64, 128>}]} {
    %c0 = arith.constant 0 : index
    %c0_0 = arith.constant 0 : index
    %0 = vector.load %arg1[%c0, %c0_0] : memref<64x128xf32, #tpu.memory_space<vmem>>, vector<64x128xf32>
    %c0_1 = arith.constant 0 : index
    %c0_2 = arith.constant 0 : index
    %1 = vector.load %arg2[%c0_1, %c0_2] : memref<64x128xf32, #tpu.memory_space<vmem>>, vector<64x128xf32>
    tpu.vector_store %arg2[%c0_1, %c0_2], %0 {strides = array<i32>} : memref<64x128xf32, #tpu.memory_space<vmem>>, vector<64x128xf32>,
    return
  }
  func.func @transform_0(%arg0: i32) -> (i32, i32) {
    %c0_i32 = arith.constant 0 : i32
    %c0_i32_0 = arith.constant 0 : i32
    return %arg0, %c0_i32 : i32, i32
  }
  func.func @transform_1(%arg0: i32) -> (i32, i32) {
    %c0_i32 = arith.constant 0 : i32
    %c0_i32_0 = arith.constant 0 : i32
    return %arg0, %c0_i32 : i32, i32
  }
}

</mosaic_0001>

<bundles_post_ra>
// kernel: tpu_custom_call.1
= control target key start
LH: loop header
LB: loop body
LE: loop exit
PB: predicated region body
PF: predicated region fallthrough
CT: control target
= control target key end

     0   :  { %6 = vsyncpa [#allocation3], 0  ;;  %s152_s0 = inlined_call_operand.hbm [shape: f32[64,128], index: 0, kind: input, shape index: {}, may-alias: {0,1}]   ;;  %s153_s1 = inlined_call_operand.hbm [shape: f32[64,128], index: 1, kind: output, shape index: {}, may-alias: {0,1}]  }
   0x1   :  { %7 = vsyncpa [#allocation4], 0  ;;  %s108_s6 = smov [#allocation2]   ;;  %s60_s10 = scalar_lea.hbm %s152_s0, 1024 }
   0x2   :  { %s13_s7 = sshll.u32 %s108_s6, 4  ;;  %p61_p0 = scmp.ne.s32.totalorder %s152_s0, %s60_s10  ;;  %s14_s7 = int_to_ptr.vmem [resolvable:$true] %s13_s7 }
   0x3   :  { %p64_p1 = scmp.lt.u32.totalorder %s60_s10, %s152_s0 }
   0x5   :  { %p66_p2 = pnand %p64_p1, %p61_p0 }
   0x7   :  { %69 = shalt.err (!%p66_p2)
}
   0x8   :  { %s70_s15 = scalar_lea.vmem %s14_s7, 1024  ;;  %p75_p4 = scmp.lt.s32.totalorder %s14_s7, %s14_s7 }
   0x9   :  { %p71_p3 = scmp.ne.s32.totalorder %s14_s7, %s70_s15  ;;  %p76_p5 = scmp.lt.s32.totalorder %s70_s15, %s70_s15 }
   0xb   :  { %p77_p6 = por %p76_p5, %p75_p4 }
   0xd   :  { %p78_p7 = pnand %p77_p6, %p71_p3 }
   0xf   :  { %81 = shalt.err (!%p78_p7)
}
  0x10   :  { %s109_s16 = smov 128   ;;  %s110_s17 = smov 8  }
  0x11   :  { %19 = dma.hbm_to_vmem [thread:$0]  %s152_s0, 1024, %s14_s7, [#allocation3], %s109_s16, %s109_s16, %s110_s17  }
  0x12   :  { %104 = dma.done.wait [#allocation3], 1024  }
  0x13   :  { %105 = vsyncadd [#allocation3], 4294966272  ;;  %s111_s20 = smov [#allocation5]   ;;  %v23_v0 = vld [vmem:[#allocation2] sm:$0xff]  ;;  %v24_v1 = vld [vmem:[#allocation2 + $0x8] sm:$0xff] }
  0x14   :  { %s44_s21 = sshll.u32 %s111_s20, 4  ;;  %v25_v2 = vld [vmem:[#allocation2 + $0x10] sm:$0xff]  ;;  %31 = vst [vmem:[#allocation5] sm:$0xff] %v23_v0  ;;  %32 = vst [vmem:[#allocation5 + $0x8] sm:$0xff] %v24_v1  ;;  %v26_v3 = vld [vmem:[#allocation2 + $0x18] sm:$0xff]  ;;  %s45_s21 = int_to_ptr.vmem [resolvable:$true] %s44_s21 }
  0x15   :  { %33 = vst [vmem:[#allocation5 + $0x10] sm:$0xff] %v25_v2  ;;  %v27_v4 = vld [vmem:[#allocation2 + $0x20] sm:$0xff]  ;;  %v28_v5 = vld [vmem:[#allocation2 + $0x28] sm:$0xff]  ;;  %34 = vst [vmem:[#allocation5 + $0x18] sm:$0xff] %v26_v3  ;;  %s82_s0 = scalar_lea.vmem %s45_s21, 1024  ;;  %p87_p9 = scmp.lt.s32.totalorder %s45_s21, %s45_s21 }
  0x16   :  { %35 = vst [vmem:[#allocation5 + $0x20] sm:$0xff] %v27_v4  ;;  %36 = vst [vmem:[#allocation5 + $0x28] sm:$0xff] %v28_v5  ;;  %v29_v6 = vld [vmem:[#allocation2 + $0x30] sm:$0xff]  ;;  %v30_v7 = vld [vmem:[#allocation2 + $0x38] sm:$0xff]  ;;  %p83_p8 = scmp.ne.s32.totalorder %s45_s21, %s82_s0  ;;  %p88_p10 = scmp.lt.s32.totalorder %s82_s0, %s82_s0 }
  0x17   :  { %37 = vst [vmem:[#allocation5 + $0x30] sm:$0xff] %v29_v6  ;;  %38 = vst [vmem:[#allocation5 + $0x38] sm:$0xff] %v30_v7 }
  0x18   :  { %p89_p11 = por %p88_p10, %p87_p9 }
  0x1a   :  { %p90_p12 = pnand %p89_p11, %p83_p8 }
  0x1c   :  { %93 = shalt.err (!%p90_p12)
}
  0x1d   :  { %s94_s24 = scalar_lea.hbm %s153_s1, 1024 }
  0x1e   :  { %p95_p13 = scmp.ne.s32.totalorder %s153_s1, %s94_s24  ;;  %p98_p0 = scmp.lt.u32.totalorder %s94_s24, %s153_s1 }
  0x20   :  { %p100_p1 = pnand %p98_p0, %p95_p13 }
  0x22   :  { %103 = shalt.err (!%p100_p1)
}
  0x23   :  { %50 = dma.vmem_to_hbm [thread:$0]  %s45_s21, 1024, %s153_s1, [#allocation4], %s109_s16, %s109_s16, %s110_s17  }
  0x24   :  { %106 = dma.done.wait [#allocation4], 1024  }
  0x25   :  { %107 = vsyncadd [#allocation4], 4294966272 }
  0x26   :  { %54 = vsyncpa [#allocation3], 1 }
  0x27   :  { %55 = vsyncpa [#allocation4], 1 }

</bundles_post_ra>
